<compile_context>
chip_gen: v7x
topology: tpu7x:2x2x1
jax: 0.10.0
libtpu: 0.0.40
codegen_flags: <defaults>
</compile_context>

<pallas_src>
import functools

import jax
import jax.numpy as jnp
from jax.experimental import pallas as pl
from jax.experimental.pallas import tpu as pltpu

_LANES = 128


def _round_up(x, m):
    return ((x + m - 1) // m) * m


def _msc_kernel(state_ref, action_ref,
                w1_ref, b1_ref,
                w2s_ref, w2a_ref, b2_ref,
                w3_ref, b3_ref,
                out_ref):
    # Layer 1: h1 = relu(state @ W1 + b1)    (bf16 MXU operands, f32 accumulate)
    h1 = jnp.dot(state_ref[...], w1_ref[...], preferred_element_type=jnp.float32)
    h1 = jnp.maximum(h1 + b1_ref[...], 0.0)

    # Layer 2: h2 = relu(h1 @ W2[:size1] + action @ W2[size1:] + b2)
    h2 = jnp.dot(h1.astype(jnp.bfloat16), w2s_ref[...],
                 preferred_element_type=jnp.float32)
    # action contribution: K = action_size (tiny) -> do it on the VPU, not the MXU
    act = action_ref[...].astype(jnp.float32)
    w2a = w2a_ref[...].astype(jnp.float32)
    for k in range(act.shape[1]):          # static, small (action_size)
        h2 = h2 + act[:, k:k + 1] * w2a[k:k + 1, :]
    h2 = jnp.maximum(h2 + b2_ref[...], 0.0)

    # Layer 3: q = h2 @ W3 + b3   (lane-dense padded output; col 0 is the real q)
    q = jnp.dot(h2.astype(jnp.bfloat16), w3_ref[...],
                preferred_element_type=jnp.float32)
    out_ref[...] = (q + b3_ref[...]).astype(out_ref.dtype)


@functools.partial(jax.jit, static_argnames=("tile_b",))
def msc_forward(state, action, params, *, tile_b=256):
    """Fused forward pass of the MSC critic (flag_batch_norm=False path)."""
    w1, b1, w2s, w2a, b2, w3, b3 = params
    batch, state_size = state.shape
    action_size = action.shape[1]
    s1p = w1.shape[1]
    s2p = w2s.shape[1]
    outp = w3.shape[1]

    # Batch tile: multiple of 8 (f32 sublane), capped at tile_b; pad batch to a multiple.
    tb = min(tile_b, _round_up(batch, 8))
    b_pad = _round_up(batch, tb)
    if b_pad != batch:
        state = jnp.pad(state, ((0, b_pad - batch), (0, 0)))
        action = jnp.pad(action, ((0, b_pad - batch), (0, 0)))

    # bf16 MXU operands (f32 accumulation inside the kernel); biases stay f32.
    state_bf = state.astype(jnp.bfloat16)
    action_bf = action.astype(jnp.bfloat16)
    w1_bf = w1.astype(jnp.bfloat16)
    w2s_bf = w2s.astype(jnp.bfloat16)
    w2a_bf = w2a.astype(jnp.bfloat16)
    w3_bf = w3.astype(jnp.bfloat16)

    grid = (b_pad // tb,)

    rep = lambda shape: pl.BlockSpec(shape, lambda i: (0, 0))   # replicated across batch tiles

    flops = 2 * b_pad * (state_size * s1p + s1p * s2p + action_size * s2p + s2p * outp)
    bytes_accessed = (
        state_bf.size * 2 + action_bf.size * 2 + b_pad * outp * 4
        + (w1_bf.size + w2s_bf.size + w2a_bf.size + w3_bf.size) * 2
        + (b1.size + b2.size + b3.size) * 4)

    out = pl.pallas_call(
        _msc_kernel,
        out_shape=jax.ShapeDtypeStruct((b_pad, outp), jnp.float32),
        grid=grid,
        in_specs=[
            pl.BlockSpec((tb, state_size), lambda i: (i, 0)),
            pl.BlockSpec((tb, action_size), lambda i: (i, 0)),
            rep((state_size, s1p)),
            rep((1, s1p)),
            rep((s1p, s2p)),
            rep((action_size, s2p)),
            rep((1, s2p)),
            rep((s2p, outp)),
            rep((1, outp)),
        ],
        out_specs=pl.BlockSpec((tb, outp), lambda i: (i, 0)),
        compiler_params=pltpu.CompilerParams(
            dimension_semantics=("parallel",)),
        cost_estimate=pl.CostEstimate(
            flops=flops, transcendentals=0, bytes_accessed=bytes_accessed),
    )(state_bf, action_bf, w1_bf, b1, w2s_bf, w2a_bf, b2, w3_bf, b3)

    return out[:batch, :1]


def init_msc_params(key, action_size, state_size, size1=111, size2=87):
    """Parameter init mirroring MSC.__init__ (uniform weights, zero biases),
    stored as [in, out] and zero-padded to lane multiples of 128."""
    s1p = _round_up(size1, _LANES)
    s2p = _round_up(size2, _LANES)
    outp = _LANES  # real output is column 0

    k1, k2, k3 = jax.random.split(key, 3)
    w1 = jax.random.uniform(k1, (state_size, size1), jnp.float32, -1.1, 1.1)
    w2 = jax.random.uniform(k2, (size1 + action_size, size2), jnp.float32, -1.1, 1.1)
    w3 = jax.random.uniform(k3, (size2, 1), jnp.float32, -0.1, 0.1)
    w2s, w2a = w2[:size1], w2[size1:]

    w1p = jnp.zeros((state_size, s1p), jnp.float32).at[:, :size1].set(w1)
    w2sp = jnp.zeros((s1p, s2p), jnp.float32).at[:size1, :size2].set(w2s)
    w2ap = jnp.zeros((action_size, s2p), jnp.float32).at[:, :size2].set(w2a)
    w3p = jnp.zeros((s2p, outp), jnp.float32).at[:size2, :1].set(w3)
    b1 = jnp.zeros((1, s1p), jnp.float32)
    b2 = jnp.zeros((1, s2p), jnp.float32)
    b3 = jnp.zeros((1, outp), jnp.float32)
    return (w1p, b1, w2sp, w2ap, b2, w3p, b3)


def msc_reference(state, action, params):
    """Pure-JAX reference emulating the kernel's bf16-operand / f32-accumulate math."""
    w1, b1, w2s, w2a, b2, w3, b3 = params
    bf = lambda x: x.astype(jnp.bfloat16).astype(jnp.float32)
    h1 = jnp.maximum(bf(state) @ bf(w1) + b1, 0.0)
    h2 = jnp.maximum(bf(h1) @ bf(w2s) + bf(action) @ bf(w2a) + b2, 0.0)
    q = bf(h2) @ bf(w3) + b3
    return q[:, :1]


if __name__ == "__main__":
    key = jax.random.PRNGKey(0)
    kp, ks, ka = jax.random.split(key, 3)

    batch = 8
    state_size = 24    # DRLND Tennis observation size
    action_size = 2    # DRLND Tennis action size

    params = init_msc_params(kp, action_size, state_size)
    state = jax.random.normal(ks, (batch, state_size), jnp.float32)
    action = jax.random.normal(ka, (batch, action_size), jnp.float32)

    out = jax.block_until_ready(msc_forward(state, action, params))
    ref = msc_reference(state, action, params)

    assert out.shape == (batch, 1)
    assert jnp.allclose(out, ref, atol=1e-2, rtol=1e-2)

    print("KERNEL_OK")
</pallas_src>

<mosaic_0001>
module attributes {stable_mosaic.version = 11 : i64} {
  func.func @_msc_kernel(%arg0: i32, %arg1: memref<8x24xbf16, #tpu.memory_space<vmem>>, %arg2: memref<8x2xbf16, #tpu.memory_space<vmem>>, %arg3: memref<24x128xbf16, #tpu.memory_space<vmem>>, %arg4: memref<1x128xf32, #tpu.memory_space<vmem>>, %arg5: memref<128x128xbf16, #tpu.memory_space<vmem>>, %arg6: memref<2x128xbf16, #tpu.memory_space<vmem>>, %arg7: memref<1x128xf32, #tpu.memory_space<vmem>>, %arg8: memref<128x128xbf16, #tpu.memory_space<vmem>>, %arg9: memref<1x128xf32, #tpu.memory_space<vmem>>, %arg10: memref<8x128xf32, #tpu.memory_space<vmem>>) attributes {dimension_semantics = [#tpu.dimension_semantics<parallel>], iteration_bounds = array<i64: 1>, scalar_prefetch = 0 : i64, scratch_operands = 0 : i64, tpu.core_type = #tpu.core_type<tc>, window_params = [{transform_indices = @transform_0, window_bounds = array<i64: 8, 24>}, {transform_indices = @transform_1, window_bounds = array<i64: 8, 2>}, {pipeline_mode = #tpu.pipeline_mode<synchronous>, transform_indices = @transform_2, window_bounds = array<i64: 24, 128>}, {pipeline_mode = #tpu.pipeline_mode<synchronous>, transform_indices = @transform_3, window_bounds = array<i64: 1, 128>}, {pipeline_mode = #tpu.pipeline_mode<synchronous>, transform_indices = @transform_4, window_bounds = array<i64: 128, 128>}, {pipeline_mode = #tpu.pipeline_mode<synchronous>, transform_indices = @transform_5, window_bounds = array<i64: 2, 128>}, {pipeline_mode = #tpu.pipeline_mode<synchronous>, transform_indices = @transform_6, window_bounds = array<i64: 1, 128>}, {pipeline_mode = #tpu.pipeline_mode<synchronous>, transform_indices = @transform_7, window_bounds = array<i64: 128, 128>}, {pipeline_mode = #tpu.pipeline_mode<synchronous>, transform_indices = @transform_8, window_bounds = array<i64: 1, 128>}, {transform_indices = @transform_9, window_bounds = array<i64: 8, 128>}]} {
    %c0 = arith.constant 0 : index
    %c0_0 = arith.constant 0 : index
    %0 = vector.load %arg1[%c0, %c0_0] : memref<8x24xbf16, #tpu.memory_space<vmem>>, vector<8x24xbf16>
    %c0_1 = arith.constant 0 : index
    %c0_2 = arith.constant 0 : index
    %1 = vector.load %arg3[%c0_1, %c0_2] : memref<24x128xbf16, #tpu.memory_space<vmem>>, vector<24x128xbf16>
    %cst = arith.constant dense<0.000000e+00> : vector<8x128xf32>
    %2 = tpu.matmul %0, %1, %cst {dimension_numbers = #tpu.dot_dimension_numbers<[1], [0], [0], [1], [0, 0, 1, 1], [], []>} : vector<8x24xbf16>, vector<24x128xbf16>, vector<8x128xf32> -> vector<8x128xf32>
    %c0_3 = arith.constant 0 : index
    %c0_4 = arith.constant 0 : index
    %3 = vector.load %arg4[%c0_3, %c0_4] : memref<1x128xf32, #tpu.memory_space<vmem>>, vector<1x128xf32>
    %4 = vector.broadcast %3 : vector<1x128xf32> to vector<8x128xf32>
    %5 = arith.addf %2, %4 : vector<8x128xf32>
    %cst_5 = arith.constant 0.000000e+00 : f32
    %6 = vector.broadcast %cst_5 : f32 to vector<8x128xf32>
    %7 = arith.maximumf %5, %6 : vector<8x128xf32>
    %8 = arith.truncf %7 : vector<8x128xf32> to vector<8x128xbf16>
    %c0_6 = arith.constant 0 : index
    %c0_7 = arith.constant 0 : index
    %9 = vector.load %arg5[%c0_6, %c0_7] : memref<128x128xbf16, #tpu.memory_space<vmem>>, vector<128x128xbf16>
    %cst_8 = arith.constant dense<0.000000e+00> : vector<8x128xf32>
    %10 = tpu.matmul %8, %9, %cst_8 {dimension_numbers = #tpu.dot_dimension_numbers<[1], [0], [0], [1], [0, 0, 1, 1], [], []>} : vector<8x128xbf16>, vector<128x128xbf16>, vector<8x128xf32> -> vector<8x128xf32>
    %c0_9 = arith.constant 0 : index
    %c0_10 = arith.constant 0 : index
    %11 = vector.load %arg2[%c0_9, %c0_10] : memref<8x2xbf16, #tpu.memory_space<vmem>>, vector<8x2xbf16>
    %12 = arith.extf %11 : vector<8x2xbf16> to vector<8x2xf32>
    %c0_11 = arith.constant 0 : index
    %c0_12 = arith.constant 0 : index
    %13 = vector.load %arg6[%c0_11, %c0_12] : memref<2x128xbf16, #tpu.memory_space<vmem>>, vector<2x128xbf16>
    %14 = arith.extf %13 : vector<2x128xbf16> to vector<2x128xf32>
    %15 = vector.extract_strided_slice %12 {offsets = [0, 0], sizes = [8, 1], strides = [1, 1]} : vector<8x2xf32> to vector<8x1xf32>
    %16 = vector.extract_strided_slice %14 {offsets = [0, 0], sizes = [1, 128], strides = [1, 1]} : vector<2x128xf32> to vector<1x128xf32>
    %17 = vector.broadcast %15 : vector<8x1xf32> to vector<8x128xf32>
    %18 = vector.broadcast %16 : vector<1x128xf32> to vector<8x128xf32>
    %19 = arith.mulf %17, %18 : vector<8x128xf32>
    %20 = arith.addf %10, %19 : vector<8x128xf32>
    %21 = vector.extract_strided_slice %12 {offsets = [0, 1], sizes = [8, 1], strides = [1, 1]} : vector<8x2xf32> to vector<8x1xf32>
    %22 = vector.extract_strided_slice %14 {offsets = [1, 0], sizes = [1, 128], strides = [1, 1]} : vector<2x128xf32> to vector<1x128xf32>
    %23 = vector.broadcast %21 : vector<8x1xf32> to vector<8x128xf32>
    %24 = vector.broadcast %22 : vector<1x128xf32> to vector<8x128xf32>
    %25 = arith.mulf %23, %24 : vector<8x128xf32>
    %26 = arith.addf %20, %25 : vector<8x128xf32>
    %c0_13 = arith.constant 0 : index
    %c0_14 = arith.constant 0 : index
    %27 = vector.load %arg7[%c0_13, %c0_14] : memref<1x128xf32, #tpu.memory_space<vmem>>, vector<1x128xf32>
    %28 = vector.broadcast %27 : vector<1x128xf32> to vector<8x128xf32>
    %29 = arith.addf %26, %28 : vector<8x128xf32>
    %cst_15 = arith.constant 0.000000e+00 : f32
    %30 = vector.broadcast %cst_15 : f32 to vector<8x128xf32>
    %31 = arith.maximumf %29, %30 : vector<8x128xf32>
    %32 = arith.truncf %31 : vector<8x128xf32> to vector<8x128xbf16>
    %c0_16 = arith.constant 0 : index
    %c0_17 = arith.constant 0 : index
    %33 = vector.load %arg8[%c0_16, %c0_17] : memref<128x128xbf16, #tpu.memory_space<vmem>>, vector<128x128xbf16>
    %cst_18 = arith.constant dense<0.000000e+00> : vector<8x128xf32>
    %34 = tpu.matmul %32, %33, %cst_18 {dimension_numbers = #tpu.dot_dimension_numbers<[1], [0], [0], [1], [0, 0, 1, 1], [], []>} : vector<8x128xbf16>, vector<128x128xbf16>, vector<8x128xf32> -> vector<8x128xf32>
    %c0_19 = arith.constant 0 : index
    %c0_20 = arith.constant 0 : index
    %35 = vector.load %arg9[%c0_19, %c0_20] : memref<1x128xf32, #tpu.memory_space<vmem>>, vector<1x128xf32>
    %36 = vector.broadcast %35 : vector<1x128xf32> to vector<8x128xf32>
    %37 = arith.addf %34, %36 : vector<8x128xf32>
    %c0_21 = arith.constant 0 : index
    %c0_22 = arith.constant 0 : index
    %38 = vector.load %arg10[%c0_21, %c0_22] : memref<8x128xf32, #tpu.memory_space<vmem>>, vector<8x128xf32>
    tpu.vector_store %arg10[%c0_21, %c0_22], %37 {strides = array<i32>} : memref<8x128xf32, #tpu.memory_space<vmem>>, vector<8x128xf32>,
    return
  }
  func.func @transform_0(%arg0: i32) -> (i32, i32) {
    %c0_i32 = arith.constant 0 : i32
    %c0_i32_0 = arith.constant 0 : i32
    return %arg0, %c0_i32 : i32, i32
  }
  func.func @transform_1(%arg0: i32) -> (i32, i32) {
    %c0_i32 = arith.constant 0 : i32
    %c0_i32_0 = arith.constant 0 : i32
    return %arg0, %c0_i32 : i32, i32
  }
  func.func @transform_2(%arg0: i32) -> (i32, i32) {
    %c0_i32 = arith.constant 0 : i32
    %c0_i32_0 = arith.constant 0 : i32
    %c0_i32_1 = arith.constant 0 : i32
    return %c0_i32, %c0_i32_0 : i32, i32
  }
  func.func @transform_3(%arg0: i32) -> (i32, i32) {
    %c0_i32 = arith.constant 0 : i32
    %c0_i32_0 = arith.constant 0 : i32
    %c0_i32_1 = arith.constant 0 : i32
    return %c0_i32, %c0_i32_0 : i32, i32
  }
  func.func @transform_4(%arg0: i32) -> (i32, i32) {
    %c0_i32 = arith.constant 0 : i32
    %c0_i32_0 = arith.constant 0 : i32
    %c0_i32_1 = arith.constant 0 : i32
    return %c0_i32, %c0_i32_0 : i32, i32
  }
  func.func @transform_5(%arg0: i32) -> (i32, i32) {
    %c0_i32 = arith.constant 0 : i32
    %c0_i32_0 = arith.constant 0 : i32
    %c0_i32_1 = arith.constant 0 : i32
    return %c0_i32, %c0_i32_0 : i32, i32
  }
  func.func @transform_6(%arg0: i32) -> (i32, i32) {
    %c0_i32 = arith.constant 0 : i32
    %c0_i32_0 = arith.constant 0 : i32
    %c0_i32_1 = arith.constant 0 : i32
    return %c0_i32, %c0_i32_0 : i32, i32
  }
  func.func @transform_7(%arg0: i32) -> (i32, i32) {
    %c0_i32 = arith.constant 0 : i32
    %c0_i32_0 = arith.constant 0 : i32
    %c0_i32_1 = arith.constant 0 : i32
    return %c0_i32, %c0_i32_0 : i32, i32
  }
  func.func @transform_8(%arg0: i32) -> (i32, i32) {
    %c0_i32 = arith.constant 0 : i32
    %c0_i32_0 = arith.constant 0 : i32
    %c0_i32_1 = arith.constant 0 : i32
    return %c0_i32, %c0_i32_0 : i32, i32
  }
  func.func @transform_9(%arg0: i32) -> (i32, i32) {
    %c0_i32 = arith.constant 0 : i32
    %c0_i32_0 = arith.constant 0 : i32
    return %arg0, %c0_i32 : i32, i32
  }
}

</mosaic_0001>

<bundles_post_ra>
// kernel: msc_forward.1
= control target key start
LH: loop header
LB: loop body
LE: loop exit
PB: predicated region body
PF: predicated region fallthrough
CT: control target
= control target key end

     0   :  { %v472_v0 = vmov 0.0   ;;  %vm57_vm0 = vcmask 1043456   ;;  %vm473_vm1 = vmmov 0   ;;  %vm53_vm2 = vcmask 195584   ;;  %s625_s2 = inlined_call_operand.vmem [shape: bf16[24,128], index: 2, kind: input, shape index: {}]   ;;  %s626_s4 = inlined_call_operand.vmem [shape: bf16[128,128], index: 4, kind: input, shape index: {}]   ;;  %s627_s0 = inlined_call_operand.vmem [shape: bf16[8,24], index: 0, kind: input, shape index: {}]   ;;  %s628_s1 = inlined_call_operand.vmem [shape: bf16[8,2], index: 1, kind: input, shape index: {}]   ;;  %s629_s7 = inlined_call_operand.vmem [shape: bf16[128,128], index: 7, kind: input, shape index: {}]   ;;  %s630_s3 = inlined_call_operand.vmem [shape: f32[1,128], index: 3, kind: input, shape index: {}]   ;;  %s631_s5 = inlined_call_operand.vmem [shape: bf16[2,128], index: 5, kind: input, shape index: {}]   ;;  %s632_s6 = inlined_call_operand.vmem [shape: f32[1,128], index: 6, kind: input, shape index: {}]   ;;  %s633_s8 = inlined_call_operand.vmem [shape: f32[1,128], index: 8, kind: input, shape index: {}]   ;;  %s634_s9 = inlined_call_operand.vmem [shape: f32[8,128], index: 9, kind: output, shape index: {}]  }
   0x1   :  { %400 = vmatprep.subr.bf16.mxu0 %v472_v0  ;;  %v454_v1 = vld [vmem:[%s625_s2] sm:$0xff]   ;;  %404 = vmatprep.mubr.msk.bf16.mxu0 %vm473_vm1, %v472_v0  ;;  %v455_v2 = vld [vmem:[%s625_s2 + $0x8] ss:$0 sps:$4 sm:$0xff]   ;;  %v458_v7 = vld [vmem:[%s626_s4 + $0x10] sm:$0xff]   ;;  %v474_v13 = vmov 0   ;;  %v475_v18 = vmov 1   ;;  %v128_v33 = vlaneseq }
   0x2   :  { %408 = vmatprep.subr.bf16.mxu1 %v472_v0  ;;  %424 = vmatprep.mubr.msk.bf16.mxu1 %vm473_vm1, %v472_v0  ;;  %v456_v3 = vld [vmem:[%s626_s4] sm:$0xff]   ;;  %v59_v4 = vsel %vm57_vm0, %v455_v2, 0  ;;  %v457_v5 = vld [vmem:[%s626_s4 + $0x8] sm:$0xff]   ;;  %v459_v8 = vld [vmem:[%s626_s4 + $0x18] sm:$0xff]  }
   0x3   :  { %401 = vmatpush3.bf16.msra.mxu0 %v454_v1  ;;  %409 = vmatpush3.bf16.msra.mxu1 %v456_v3  ;;  %v33_v6 = vld [vmem:[%s627_s0] sm:$0xf]  ;;  %v461_v10 = vld [vmem:[%s626_s4 + $0x28] sm:$0xff]   ;;  %v462_v11 = vld [vmem:[%s626_s4 + $0x30] sm:$0xff]   ;;  %v129_v34 = vshrl.u32 %v128_v33, 7 }
   0x4   :  { %402 = vmatprep.subr.bf16.mxu0 %v472_v0  ;;  %410 = vmatprep.subr.bf16.mxu1 %v472_v0  ;;  %v460_v9 = vld [vmem:[%s626_s4 + $0x20] sm:$0xff]   ;;  %v463_v12 = vld [vmem:[%s626_s4 + $0x38] sm:$0xff]   ;;  %v465_v17 = vld [vmem:[%s629_s7 + $0x8] sm:$0xff]  }
   0x5   :  { %452 = vset.pattern.permute.xlu0 %v474_v13  ;;  %v119_v14 = vld [vmem:[%s628_s1] sm:$0xf]  ;;  %v466_v19 = vld [vmem:[%s629_s7 + $0x10] sm:$0xff]   ;;  %v467_v20 = vld [vmem:[%s629_s7 + $0x18] sm:$0xff]   ;;  %v130_v38 = vsub.s32 0, %v129_v34  ;;  %v227_v39 = vsub.s32 1, %v129_v34 }
   0x6   :  { %v120_v15 = vunpack.c.l.bf16 %v119_v14  ;;  %v464_v16 = vld [vmem:[%s629_s7] sm:$0xff]   ;;  %v469_v30 = vld [vmem:[%s629_s7 + $0x28] sm:$0xff]   ;;  %v470_v31 = vld [vmem:[%s629_s7 + $0x30] sm:$0xff]  }
   0x7   :  { %403 = vmatpush3.bf16.msra.mxu0 %v59_v4  ;;  %411 = vmatpush3.bf16.msra.mxu1 %v457_v5  ;;  %v468_v21 = vld [vmem:[%s629_s7 + $0x20] sm:$0xff]   ;;  %v471_v32 = vld [vmem:[%s629_s7 + $0x38] sm:$0xff]  }
   0x8   :  { %428 = vmatprep.subr.bf16.mxu0 %v472_v0  ;;  %412 = vmatprep.subr.bf16.mxu1 %v472_v0  ;;  %v357_v22 = vld [vmem:[%s630_s3] ss:$0 sm:$0xff] }
   0x9   :  { %125 = vperm.xlu0 %452, %v120_v15   ;;  %v121_v35 = vld [vmem:[%s631_s5] sm:$0x1] }
   0xa   :  { %405 = vmatmul.mubr.msk.bf16.vlgmr.msra.gmra.mrb[0].mxu0 %vm53_vm2, %v33_v6  ;;  %v122_v37 = vunpack.c.l.bf16 %v121_v35  ;;  %v369_v48 = vld [vmem:[%s632_s6] ss:$0 sm:$0xff] }
   0xb   :  { %444 = vmatprep.mubr.msk.bf16.mxu0 %vm473_vm1, %v472_v0  ;;  %413 = vmatpush3.bf16.msra.mxu1 %v458_v7  ;;  %v370_v55 = vld [vmem:[%s633_s8] ss:$0 sm:$0xff] }
   0xc   :  { %414 = vmatprep.subr.bf16.mxu1 %v472_v0  ;;  %429 = vmatpush3.bf16.msra.mxu0 %v464_v16  ;;  %v131_v40 = vrot.slane %v122_v37, %v130_v38  ;;  %v228_v41 = vrot.slane %v122_v37, %v227_v39 }
   0xd   :  { %430 = vmatprep.subr.bf16.mxu0 %v472_v0  ;;  %453 = vset.pattern.permute.xlu0 %v475_v18 }
   0xe   :  { %222 = vperm.xlu0 %453, %v120_v15  }
   0xf   :  { %415 = vmatpush3.bf16.msra.mxu1 %v459_v8 }
  0x10   :  { %416 = vmatprep.subr.bf16.mxu1 %v472_v0  ;;  %431 = vmatpush3.bf16.msra.mxu0 %v465_v17 }
  0x11   :  { %432 = vmatprep.subr.bf16.mxu0 %v472_v0 }
  0x13   :  { %417 = vmatpush3.bf16.msra.mxu1 %v460_v9 }
  0x14   :  { %418 = vmatprep.subr.bf16.mxu1 %v472_v0  ;;  %433 = vmatpush3.bf16.msra.mxu0 %v466_v19 }
  0x15   :  { %434 = vmatprep.subr.bf16.mxu0 %v472_v0 }
  0x17   :  { %419 = vmatpush3.bf16.msra.mxu1 %v461_v10 }
  0x18   :  { %420 = vmatprep.subr.bf16.mxu1 %v472_v0  ;;  %435 = vmatpush3.bf16.msra.mxu0 %v467_v20 }
  0x19   :  { %436 = vmatprep.subr.bf16.mxu0 %v472_v0 }
  0x1b   :  { %421 = vmatpush3.bf16.msra.mxu1 %v462_v11 }
  0x1c   :  { %422 = vmatprep.subr.bf16.mxu1 %v472_v0  ;;  %437 = vmatpush3.bf16.msra.mxu0 %v468_v21 }
  0x1d   :  { %438 = vmatprep.subr.bf16.mxu0 %v472_v0 }
  0x1f   :  { %423 = vmatpush3.bf16.msra.mxu1 %v463_v12 }
  0x20   :  { %439 = vmatpush3.bf16.msra.mxu0 %v469_v30 }
  0x21   :  { %440 = vmatprep.subr.bf16.mxu0 %v472_v0 }
  0x24   :  { %441 = vmatpush3.bf16.msra.mxu0 %v470_v31 }
  0x25   :  { %442 = vmatprep.subr.bf16.mxu0 %v472_v0 }
  0x28   :  { %443 = vmatpush3.bf16.msra.mxu0 %v471_v32 }
  0x88   :  { %v126_v36 = vpop.permute.xlu0 %125 }
  0x89   :  { %v132_v43 = vmul.f32 %v131_v40, %v126_v36 }
  0x8d   :  { %v223_v42 = vpop.permute.xlu0 %222 }
  0x8e   :  { %v229_v44 = vmul.f32 %v228_v41, %v223_v42 }
  0xdd   :  { %v95_v23 = vpop.f32.mrb[0].mxu0 }
  0xde   :  { %v96_v24 = vadd.f32 %v357_v22, %v95_v23  ;;  %v406_v25 = vpop.f32.mrb[1].mxu0 }
  0xdf   :  { %v98_v26 = vpop.f32.mrb[2].mxu0 }
  0xe0   :  { %v101_v27 = vmax.f32 %v96_v24, 0.0  ;;  %v407_v28 = vpop.f32.mrb[3].mxu0 }
  0xe2   :  { %v102_v29 = vpack.c.bf16 %v101_v27, %v101_v27 }
  0xe4   :  { %425 = vmatmul.mubr.bf16.vlgmr.msra.gmra.mrb[0].mxu1 %v102_v29 }
 0x1b7   :  { %v215_v45 = vpop.f32.mrb[0].mxu1 }
 0x1b8   :  { %v216_v46 = vadd.f32 %v215_v45, %v132_v43  ;;  %v426_v47 = vpop.f32.mrb[1].mxu1 }
 0x1b9   :  { %v218_v49 = vpop.f32.mrb[2].mxu1 }
 0x1ba   :  { %v230_v50 = vadd.f32 %v229_v44, %v216_v46  ;;  %v427_v51 = vpop.f32.mrb[3].mxu1 }
 0x1bc   :  { %v238_v52 = vadd.f32 %v369_v48, %v230_v50 }
 0x1be   :  { %v239_v53 = vmax.f32 %v238_v52, 0.0 }
 0x1c0   :  { %v240_v54 = vpack.c.bf16 %v239_v53, %v239_v53 }
 0x1c2   :  { %445 = vmatmul.mubr.bf16.vlgmr.msra.gmra.mrb[4].mxu0 %v240_v54 }
 0x295   :  { %v346_v56 = vpop.f32.mrb[4].mxu0 }
 0x296   :  { %v347_v57 = vadd.f32 %v370_v55, %v346_v56  ;;  %v446_v58 = vpop.f32.mrb[5].mxu0 }
 0x297   :  { %v349_v59 = vpop.f32.mrb[6].mxu0 }
 0x298   :  { %352 = vst [vmem:[%s634_s9] sm:$0xff] %v347_v57  ;;  %v447_v60 = vpop.f32.mrb[7].mxu0 }

</bundles_post_ra>
